<compile_context>
chip_gen: v7x
topology: tpu7x:2x2x1
jax: 0.10.0
libtpu: 0.0.40
codegen_flags: <defaults>
</compile_context>

<pallas_src>
import functools

import jax
import jax.numpy as jnp
from jax import lax
from jax.experimental import pallas as pl
from jax.experimental.pallas import tpu as pltpu


def _elu(v):
    # ELU(alpha=1): v if v > 0 else exp(v) - 1  (computed in f32, EUP exp)
    return jnp.where(v > 0, v, jnp.exp(jnp.minimum(v, 0.0)) - 1.0)


def _encoder_block_kernel(x_ref, w7_ref, b7_ref, w1_ref, b1_ref, wf_ref, bf_ref,
                          out_ref, pad_ref, *, T, C, stride, T_out, max_pad):
    f32 = jnp.float32
    bf16 = jnp.bfloat16

    # Left-padding region is always zero; the live signal sits at rows
    # [max_pad, max_pad + T) of the scratch buffer.  Re-zero every grid step:
    # it is tiny (max_pad x C) and keeps the kernel correct when the batch
    # grid axis is sharded across TensorCores (each core has its own scratch).
    pad_ref[0:max_pad, :] = jnp.zeros((max_pad, C), f32)

    h = x_ref[0].astype(f32)                                   # (T, C)

    # ---- three ResidualUnits (dilations 1, 3, 9), ELU after each ------------
    for i, d in enumerate((1, 3, 9)):
        pad_ref[max_pad:max_pad + T, :] = h
        # im2col: tap j reads x[t - (6 - j) * d].  Build a single (T, 7*C)
        # operand and issue ONE MXU matmul against w7 reshaped to (7*C, C).
        taps = [
            pad_ref[max_pad - 6 * d + j * d: max_pad - 6 * d + j * d + T, :]
            for j in range(7)
        ]
        im7 = jnp.concatenate(taps, axis=-1).astype(bf16)      # (T, 7*C) bf16
        y = jnp.dot(im7, w7_ref[i], preferred_element_type=f32) + b7_ref[i]
        y = _elu(y)                                            # conv7 -> ELU
        z = jnp.dot(y.astype(bf16), w1_ref[i],
                    preferred_element_type=f32) + b1_ref[i]    # 1x1 conv
        h = _elu(h + z)                                        # residual + ELU

    # ---- final CausalConv1d: kernel = 2*stride, stride = stride --------------
    # Computed directly at output resolution: tap k reads x[t*s + k - (2s-1)]
    # via a strided pl.ds load; taps concatenated -> one matmul.
    # TODO(synk): for very long T, tile the time axis with a 6*9 halo instead
    # of holding the whole padded signal in one VMEM scratch.
    pad_ref[max_pad:max_pad + T, :] = h
    kf = 2 * stride
    base = max_pad - (kf - 1)
    taps = [pad_ref[pl.ds(base + k, T_out, stride=stride), :] for k in range(kf)]
    imf = jnp.concatenate(taps, axis=-1).astype(bf16)          # (T_out, 2s*C)
    out = jnp.dot(imf, wf_ref[...], preferred_element_type=f32) + bf_ref[...]
    out_ref[0] = out.astype(out_ref.dtype)


def encoder_block_pallas(x_ncw, kernel_params, stride):
    """x_ncw: (N, C, T) float32 (PyTorch layout).  Returns (N, 2*C, T_out)."""
    w7_k, b7_k, w1_k, b1_k, wf_k, bf_k = kernel_params
    N, C, T = x_ncw.shape
    T_out = (T - 1) // stride + 1
    # Room for the worst causal pad (6*9 for the d=9 conv7, 2s-1 for the final
    # conv), rounded up to a sublane multiple so stores stay tile-aligned.
    max_pad = ((max(6 * 9, 2 * stride - 1) + 7) // 8) * 8

    x_ntc = jnp.transpose(x_ncw, (0, 2, 1)).astype(jnp.float32)

    kernel = functools.partial(_encoder_block_kernel, T=T, C=C, stride=stride,
                               T_out=T_out, max_pad=max_pad)

    def full_spec(shape):
        rank = len(shape)
        return pl.BlockSpec(shape, lambda n, _r=rank: (0,) * _r)

    # Advisory cost estimate (fused im2col matmuls + ELU transcendentals).
    flops = N * (3 * 2 * T * (7 * C) * C          # three dilated conv7s
                 + 3 * 2 * T * C * C              # three 1x1 convs
                 + 2 * T_out * (2 * stride * C) * (2 * C))  # final strided conv
    transcendentals = N * 6 * T * C
    bytes_accessed = (x_ntc.size * 4 + N * T_out * 2 * C * 4
                      + sum(int(a.size) * a.dtype.itemsize
                            for a in (w7_k, b7_k, w1_k, b1_k, wf_k, bf_k)))

    out = pl.pallas_call(
        kernel,
        out_shape=jax.ShapeDtypeStruct((N, T_out, 2 * C), jnp.float32),
        grid_spec=pltpu.PrefetchScalarGridSpec(
            num_scalar_prefetch=0,
            grid=(N,),
            in_specs=[
                pl.BlockSpec((1, T, C), lambda n: (n, 0, 0)),
                full_spec(w7_k.shape),
                full_spec(b7_k.shape),
                full_spec(w1_k.shape),
                full_spec(b1_k.shape),
                full_spec(wf_k.shape),
                full_spec(bf_k.shape),
            ],
            out_specs=pl.BlockSpec((1, T_out, 2 * C), lambda n: (n, 0, 0)),
            scratch_shapes=[pltpu.VMEM((max_pad + T, C), jnp.float32)],
        ),
        compiler_params=pltpu.CompilerParams(dimension_semantics=("parallel",)),
        cost_estimate=pl.CostEstimate(flops=flops,
                                      transcendentals=transcendentals,
                                      bytes_accessed=bytes_accessed),
    )(x_ntc, w7_k, b7_k, w1_k, b1_k, wf_k, bf_k)

    return jnp.transpose(out, (0, 2, 1))                       # back to NCW


# ------------------------- parameter setup (glue) ----------------------------
def init_params_torch_layout(key, C, stride):
    """Deterministic synthetic params in PyTorch Conv1d layout (O, I, K)."""
    keys = jax.random.split(key, 14)

    def nrm(k, shape, scale=0.2):
        return scale * jax.random.normal(k, shape, jnp.float32)

    w7, b7, w1, b1 = [], [], [], []
    ki = 0
    for _ in range(3):
        w7.append(nrm(keys[ki], (C, C, 7))); ki += 1
        b7.append(nrm(keys[ki], (C,)));      ki += 1
        w1.append(nrm(keys[ki], (C, C, 1))); ki += 1
        b1.append(nrm(keys[ki], (C,)));      ki += 1
    wf = nrm(keys[ki], (2 * C, C, 2 * stride)); ki += 1
    bf = nrm(keys[ki], (2 * C,))
    return (w7, b7, w1, b1, wf, bf)


def to_kernel_layout(torch_p):
    """Pre-transpose & pre-flatten weights into im2col matmul operands (bf16)."""
    w7, b7, w1, b1, wf, bf = torch_p
    C = w7[0].shape[1]
    # (O, I, K) -> (K, I, O) -> (K*I, O): row index = tap*C + c_in
    w7_k = jnp.stack(
        [jnp.transpose(w, (2, 1, 0)).reshape(7 * C, C) for w in w7]
    ).astype(jnp.bfloat16)                                        # (3, 7C, C)
    b7_k = jnp.stack([b[None, :] for b in b7])                    # (3, 1, C) f32
    w1_k = jnp.stack([jnp.transpose(w[:, :, 0]) for w in w1]
                     ).astype(jnp.bfloat16)                       # (3, C, C)
    b1_k = jnp.stack([b[None, :] for b in b1])                    # (3, 1, C) f32
    wf_k = jnp.transpose(wf, (2, 1, 0)).reshape(-1, wf.shape[0]
                                                ).astype(jnp.bfloat16)  # (2sC, 2C)
    bf_k = bf[None, :]                                            # (1, 2C) f32
    return (w7_k, b7_k, w1_k, b1_k, wf_k, bf_k)


# ------------------------- pure-JAX reference (for checking) -----------------
def _causal_conv1d_ref(x, w, b, stride, dilation):
    k = w.shape[-1]
    pad = dilation * (k - 1)
    y = lax.conv_general_dilated(
        x, w, window_strides=(stride,), padding=[(pad, 0)],
        rhs_dilation=(dilation,), dimension_numbers=("NCH", "OIH", "NCH"))
    return y + b[None, :, None]


def encoder_block_ref(x, torch_p, stride):
    w7, b7, w1, b1, wf, bf = torch_p
    h = x
    for i, d in enumerate((1, 3, 9)):
        y = _causal_conv1d_ref(h, w7[i], b7[i], 1, d)
        y = jax.nn.elu(y)
        z = lax.conv_general_dilated(
            y, w1[i], window_strides=(1,), padding=[(0, 0)],
            dimension_numbers=("NCH", "OIH", "NCH")) + b1[i][None, :, None]
        h = jax.nn.elu(h + z)
    return _causal_conv1d_ref(h, wf, bf, stride, 1)


if __name__ == "__main__":
    out_channels = 8          # EncoderBlock(out_channels=8, stride=2)
    stride = 2
    C = out_channels // 2     # residual-unit channel width
    N, T = 2, 16

    key = jax.random.PRNGKey(0)
    kx, kp = jax.random.split(key)
    x = jax.random.normal(kx, (N, C, T), jnp.float32)          # NCW, like torch

    torch_p = init_params_torch_layout(kp, C, stride)
    kern_p = to_kernel_layout(torch_p)

    out = encoder_block_pallas(x, kern_p, stride)
    out = jax.block_until_ready(out)

    ref = encoder_block_ref(x, torch_p, stride)
    assert out.shape == (N, out_channels, (T - 1) // stride + 1), out.shape
    err = jnp.max(jnp.abs(out - ref))
    # Matmul operands are bf16 (f32 accumulation) -> looser tolerance.
    if not jnp.allclose(out, ref, atol=5e-2, rtol=5e-2):
        raise AssertionError(f"mismatch vs reference, max abs err = {err}")
    print("KERNEL_OK")
</pallas_src>

<mosaic_0001>
module attributes {stable_mosaic.version = 11 : i64} {
  func.func @_encoder_block_kernel(%arg0: i32, %arg1: memref<1x16x4xf32, #tpu.memory_space<vmem>>, %arg2: memref<3x28x4xbf16, #tpu.memory_space<vmem>>, %arg3: memref<3x1x4xf32, #tpu.memory_space<vmem>>, %arg4: memref<3x4x4xbf16, #tpu.memory_space<vmem>>, %arg5: memref<3x1x4xf32, #tpu.memory_space<vmem>>, %arg6: memref<16x8xbf16, #tpu.memory_space<vmem>>, %arg7: memref<1x8xf32, #tpu.memory_space<vmem>>, %arg8: memref<1x8x8xf32, #tpu.memory_space<vmem>>, %arg9: memref<72x4xf32, #tpu.memory_space<vmem>>) attributes {dimension_semantics = [#tpu.dimension_semantics<parallel>], iteration_bounds = array<i64: 2>, scalar_prefetch = 0 : i64, scratch_operands = 1 : i64, tpu.core_type = #tpu.core_type<tc>, window_params = [{transform_indices = @transform_0, window_bounds = array<i64: 1, 16, 4>}, {pipeline_mode = #tpu.pipeline_mode<synchronous>, transform_indices = @transform_1, window_bounds = array<i64: 3, 28, 4>}, {pipeline_mode = #tpu.pipeline_mode<synchronous>, transform_indices = @transform_2, window_bounds = array<i64: 3, 1, 4>}, {pipeline_mode = #tpu.pipeline_mode<synchronous>, transform_indices = @transform_3, window_bounds = array<i64: 3, 4, 4>}, {pipeline_mode = #tpu.pipeline_mode<synchronous>, transform_indices = @transform_4, window_bounds = array<i64: 3, 1, 4>}, {pipeline_mode = #tpu.pipeline_mode<synchronous>, transform_indices = @transform_5, window_bounds = array<i64: 16, 8>}, {pipeline_mode = #tpu.pipeline_mode<synchronous>, transform_indices = @transform_6, window_bounds = array<i64: 1, 8>}, {transform_indices = @transform_7, window_bounds = array<i64: 1, 8, 8>}]} {
    %cst = arith.constant 0.000000e+00 : f32
    %0 = vector.broadcast %cst : f32 to vector<56x4xf32>
    %c0 = arith.constant 0 : index
    %c0_0 = arith.constant 0 : index
    %1 = vector.load %arg9[%c0, %c0_0] : memref<72x4xf32, #tpu.memory_space<vmem>>, vector<56x4xf32>
    tpu.vector_store %arg9[%c0, %c0_0], %0 {strides = array<i32>} : memref<72x4xf32, #tpu.memory_space<vmem>>, vector<56x4xf32>,
    %c0_1 = arith.constant 0 : index
    %c0_2 = arith.constant 0 : index
    %c0_3 = arith.constant 0 : index
    %2 = vector.load %arg1[%c0_1, %c0_2, %c0_3] : memref<1x16x4xf32, #tpu.memory_space<vmem>>, vector<1x16x4xf32>
    %3 = vector.shape_cast %2 : vector<1x16x4xf32> to vector<16x4xf32>
    %c56 = arith.constant 56 : index
    %c0_4 = arith.constant 0 : index
    %4 = vector.load %arg9[%c56, %c0_4] : memref<72x4xf32, #tpu.memory_space<vmem>>, vector<16x4xf32>
    tpu.vector_store %arg9[%c56, %c0_4], %3 {strides = array<i32>} : memref<72x4xf32, #tpu.memory_space<vmem>>, vector<16x4xf32>,
    %c50 = arith.constant 50 : index
    %c0_5 = arith.constant 0 : index
    %5 = vector.load %arg9[%c50, %c0_5] : memref<72x4xf32, #tpu.memory_space<vmem>>, vector<16x4xf32>
    %c51 = arith.constant 51 : index
    %c0_6 = arith.constant 0 : index
    %6 = vector.load %arg9[%c51, %c0_6] : memref<72x4xf32, #tpu.memory_space<vmem>>, vector<16x4xf32>
    %c52 = arith.constant 52 : index
    %c0_7 = arith.constant 0 : index
    %7 = vector.load %arg9[%c52, %c0_7] : memref<72x4xf32, #tpu.memory_space<vmem>>, vector<16x4xf32>
    %c53 = arith.constant 53 : index
    %c0_8 = arith.constant 0 : index
    %8 = vector.load %arg9[%c53, %c0_8] : memref<72x4xf32, #tpu.memory_space<vmem>>, vector<16x4xf32>
    %c54 = arith.constant 54 : index
    %c0_9 = arith.constant 0 : index
    %9 = vector.load %arg9[%c54, %c0_9] : memref<72x4xf32, #tpu.memory_space<vmem>>, vector<16x4xf32>
    %c55 = arith.constant 55 : index
    %c0_10 = arith.constant 0 : index
    %10 = vector.load %arg9[%c55, %c0_10] : memref<72x4xf32, #tpu.memory_space<vmem>>, vector<16x4xf32>
    %c56_11 = arith.constant 56 : index
    %c0_12 = arith.constant 0 : index
    %11 = vector.load %arg9[%c56_11, %c0_12] : memref<72x4xf32, #tpu.memory_space<vmem>>, vector<16x4xf32>
    %12 = tpu.concatenate %5, %6, %7, %8, %9, %10, %11 in 1 : vector<16x4xf32>, vector<16x4xf32>, vector<16x4xf32>, vector<16x4xf32>, vector<16x4xf32>, vector<16x4xf32>, vector<16x4xf32> -> vector<16x28xf32>
    %13 = arith.truncf %12 : vector<16x28xf32> to vector<16x28xbf16>
    %c0_13 = arith.constant 0 : index
    %c0_14 = arith.constant 0 : index
    %c0_15 = arith.constant 0 : index
    %14 = vector.load %arg2[%c0_13, %c0_14, %c0_15] : memref<3x28x4xbf16, #tpu.memory_space<vmem>>, vector<1x28x4xbf16>
    %15 = vector.shape_cast %14 : vector<1x28x4xbf16> to vector<28x4xbf16>
    %cst_16 = arith.constant dense<0.000000e+00> : vector<16x4xf32>
    %16 = tpu.matmul %13, %15, %cst_16 {dimension_numbers = #tpu.dot_dimension_numbers<[1], [0], [0], [1], [0, 0, 1, 1], [], []>} : vector<16x28xbf16>, vector<28x4xbf16>, vector<16x4xf32> -> vector<16x4xf32>
    %c0_17 = arith.constant 0 : index
    %c0_18 = arith.constant 0 : index
    %c0_19 = arith.constant 0 : index
    %17 = vector.load %arg3[%c0_17, %c0_18, %c0_19] : memref<3x1x4xf32, #tpu.memory_space<vmem>>, vector<1x1x4xf32>
    %18 = vector.shape_cast %17 : vector<1x1x4xf32> to vector<1x4xf32>
    %19 = vector.broadcast %18 : vector<1x4xf32> to vector<16x4xf32>
    %20 = arith.addf %16, %19 : vector<16x4xf32>
    %cst_20 = arith.constant 0.000000e+00 : f32
    %21 = vector.broadcast %cst_20 : f32 to vector<16x4xf32>
    %22 = arith.cmpf ogt, %20, %21 : vector<16x4xf32>
    %cst_21 = arith.constant 0.000000e+00 : f32
    %23 = vector.broadcast %cst_21 : f32 to vector<16x4xf32>
    %24 = arith.minimumf %20, %23 : vector<16x4xf32>
    %25 = math.exp %24 : vector<16x4xf32>
    %cst_22 = arith.constant 1.000000e+00 : f32
    %26 = vector.broadcast %cst_22 : f32 to vector<16x4xf32>
    %27 = arith.subf %25, %26 : vector<16x4xf32>
    %28 = arith.select %22, %20, %27 : vector<16x4xi1>, vector<16x4xf32>
    %29 = arith.truncf %28 : vector<16x4xf32> to vector<16x4xbf16>
    %c0_23 = arith.constant 0 : index
    %c0_24 = arith.constant 0 : index
    %c0_25 = arith.constant 0 : index
    %30 = vector.load %arg4[%c0_23, %c0_24, %c0_25] : memref<3x4x4xbf16, #tpu.memory_space<vmem>>, vector<1x4x4xbf16>
    %31 = vector.shape_cast %30 : vector<1x4x4xbf16> to vector<4x4xbf16>
    %cst_26 = arith.constant dense<0.000000e+00> : vector<16x4xf32>
    %32 = tpu.matmul %29, %31, %cst_26 {dimension_numbers = #tpu.dot_dimension_numbers<[1], [0], [0], [1], [0, 0, 1, 1], [], []>} : vector<16x4xbf16>, vector<4x4xbf16>, vector<16x4xf32> -> vector<16x4xf32>
    %c0_27 = arith.constant 0 : index
    %c0_28 = arith.constant 0 : index
    %c0_29 = arith.constant 0 : index
    %33 = vector.load %arg5[%c0_27, %c0_28, %c0_29] : memref<3x1x4xf32, #tpu.memory_space<vmem>>, vector<1x1x4xf32>
    %34 = vector.shape_cast %33 : vector<1x1x4xf32> to vector<1x4xf32>
    %35 = vector.broadcast %34 : vector<1x4xf32> to vector<16x4xf32>
    %36 = arith.addf %32, %35 : vector<16x4xf32>
    %37 = arith.addf %3, %36 : vector<16x4xf32>
    %cst_30 = arith.constant 0.000000e+00 : f32
    %38 = vector.broadcast %cst_30 : f32 to vector<16x4xf32>
    %39 = arith.cmpf ogt, %37, %38 : vector<16x4xf32>
    %cst_31 = arith.constant 0.000000e+00 : f32
    %40 = vector.broadcast %cst_31 : f32 to vector<16x4xf32>
    %41 = arith.minimumf %37, %40 : vector<16x4xf32>
    %42 = math.exp %41 : vector<16x4xf32>
    %cst_32 = arith.constant 1.000000e+00 : f32
    %43 = vector.broadcast %cst_32 : f32 to vector<16x4xf32>
    %44 = arith.subf %42, %43 : vector<16x4xf32>
    %45 = arith.select %39, %37, %44 : vector<16x4xi1>, vector<16x4xf32>
    %c56_33 = arith.constant 56 : index
    %c0_34 = arith.constant 0 : index
    %46 = vector.load %arg9[%c56_33, %c0_34] : memref<72x4xf32, #tpu.memory_space<vmem>>, vector<16x4xf32>
    tpu.vector_store %arg9[%c56_33, %c0_34], %45 {strides = array<i32>} : memref<72x4xf32, #tpu.memory_space<vmem>>, vector<16x4xf32>,
    %c38 = arith.constant 38 : index
    %c0_35 = arith.constant 0 : index
    %47 = vector.load %arg9[%c38, %c0_35] : memref<72x4xf32, #tpu.memory_space<vmem>>, vector<16x4xf32>
    %c41 = arith.constant 41 : index
    %c0_36 = arith.constant 0 : index
    %48 = vector.load %arg9[%c41, %c0_36] : memref<72x4xf32, #tpu.memory_space<vmem>>, vector<16x4xf32>
    %c44 = arith.constant 44 : index
    %c0_37 = arith.constant 0 : index
    %49 = vector.load %arg9[%c44, %c0_37] : memref<72x4xf32, #tpu.memory_space<vmem>>, vector<16x4xf32>
    %c47 = arith.constant 47 : index
    %c0_38 = arith.constant 0 : index
    %50 = vector.load %arg9[%c47, %c0_38] : memref<72x4xf32, #tpu.memory_space<vmem>>, vector<16x4xf32>
    %c50_39 = arith.constant 50 : index
    %c0_40 = arith.constant 0 : index
    %51 = vector.load %arg9[%c50_39, %c0_40] : memref<72x4xf32, #tpu.memory_space<vmem>>, vector<16x4xf32>
    %c53_41 = arith.constant 53 : index
    %c0_42 = arith.constant 0 : index
    %52 = vector.load %arg9[%c53_41, %c0_42] : memref<72x4xf32, #tpu.memory_space<vmem>>, vector<16x4xf32>
    %c56_43 = arith.constant 56 : index
    %c0_44 = arith.constant 0 : index
    %53 = vector.load %arg9[%c56_43, %c0_44] : memref<72x4xf32, #tpu.memory_space<vmem>>, vector<16x4xf32>
    %54 = tpu.concatenate %47, %48, %49, %50, %51, %52, %53 in 1 : vector<16x4xf32>, vector<16x4xf32>, vector<16x4xf32>, vector<16x4xf32>, vector<16x4xf32>, vector<16x4xf32>, vector<16x4xf32> -> vector<16x28xf32>
    %55 = arith.truncf %54 : vector<16x28xf32> to vector<16x28xbf16>
    %c1 = arith.constant 1 : index
    %c0_45 = arith.constant 0 : index
    %c0_46 = arith.constant 0 : index
    %56 = vector.load %arg2[%c1, %c0_45, %c0_46] : memref<3x28x4xbf16, #tpu.memory_space<vmem>>, vector<1x28x4xbf16>
    %57 = vector.shape_cast %56 : vector<1x28x4xbf16> to vector<28x4xbf16>
    %cst_47 = arith.constant dense<0.000000e+00> : vector<16x4xf32>
    %58 = tpu.matmul %55, %57, %cst_47 {dimension_numbers = #tpu.dot_dimension_numbers<[1], [0], [0], [1], [0, 0, 1, 1], [], []>} : vector<16x28xbf16>, vector<28x4xbf16>, vector<16x4xf32> -> vector<16x4xf32>
    %c1_48 = arith.constant 1 : index
    %c0_49 = arith.constant 0 : index
    %c0_50 = arith.constant 0 : index
    %59 = vector.load %arg3[%c1_48, %c0_49, %c0_50] : memref<3x1x4xf32, #tpu.memory_space<vmem>>, vector<1x1x4xf32>
    %60 = vector.shape_cast %59 : vector<1x1x4xf32> to vector<1x4xf32>
    %61 = vector.broadcast %60 : vector<1x4xf32> to vector<16x4xf32>
    %62 = arith.addf %58, %61 : vector<16x4xf32>
    %cst_51 = arith.constant 0.000000e+00 : f32
    %63 = vector.broadcast %cst_51 : f32 to vector<16x4xf32>
    %64 = arith.cmpf ogt, %62, %63 : vector<16x4xf32>
    %cst_52 = arith.constant 0.000000e+00 : f32
    %65 = vector.broadcast %cst_52 : f32 to vector<16x4xf32>
    %66 = arith.minimumf %62, %65 : vector<16x4xf32>
    %67 = math.exp %66 : vector<16x4xf32>
    %cst_53 = arith.constant 1.000000e+00 : f32
    %68 = vector.broadcast %cst_53 : f32 to vector<16x4xf32>
    %69 = arith.subf %67, %68 : vector<16x4xf32>
    %70 = arith.select %64, %62, %69 : vector<16x4xi1>, vector<16x4xf32>
    %71 = arith.truncf %70 : vector<16x4xf32> to vector<16x4xbf16>
    %c1_54 = arith.constant 1 : index
    %c0_55 = arith.constant 0 : index
    %c0_56 = arith.constant 0 : index
    %72 = vector.load %arg4[%c1_54, %c0_55, %c0_56] : memref<3x4x4xbf16, #tpu.memory_space<vmem>>, vector<1x4x4xbf16>
    %73 = vector.shape_cast %72 : vector<1x4x4xbf16> to vector<4x4xbf16>
    %cst_57 = arith.constant dense<0.000000e+00> : vector<16x4xf32>
    %74 = tpu.matmul %71, %73, %cst_57 {dimension_numbers = #tpu.dot_dimension_numbers<[1], [0], [0], [1], [0, 0, 1, 1], [], []>} : vector<16x4xbf16>, vector<4x4xbf16>, vector<16x4xf32> -> vector<16x4xf32>
    %c1_58 = arith.constant 1 : index
    %c0_59 = arith.constant 0 : index
    %c0_60 = arith.constant 0 : index
    %75 = vector.load %arg5[%c1_58, %c0_59, %c0_60] : memref<3x1x4xf32, #tpu.memory_space<vmem>>, vector<1x1x4xf32>
    %76 = vector.shape_cast %75 : vector<1x1x4xf32> to vector<1x4xf32>
    %77 = vector.broadcast %76 : vector<1x4xf32> to vector<16x4xf32>
    %78 = arith.addf %74, %77 : vector<16x4xf32>
    %79 = arith.addf %45, %78 : vector<16x4xf32>
    %cst_61 = arith.constant 0.000000e+00 : f32
    %80 = vector.broadcast %cst_61 : f32 to vector<16x4xf32>
    %81 = arith.cmpf ogt, %79, %80 : vector<16x4xf32>
    %cst_62 = arith.constant 0.000000e+00 : f32
    %82 = vector.broadcast %cst_62 : f32 to vector<16x4xf32>
    %83 = arith.minimumf %79, %82 : vector<16x4xf32>
    %84 = math.exp %83 : vector<16x4xf32>
    %cst_63 = arith.constant 1.000000e+00 : f32
    %85 = vector.broadcast %cst_63 : f32 to vector<16x4xf32>
    %86 = arith.subf %84, %85 : vector<16x4xf32>
    %87 = arith.select %81, %79, %86 : vector<16x4xi1>, vector<16x4xf32>
    %c56_64 = arith.constant 56 : index
    %c0_65 = arith.constant 0 : index
    %88 = vector.load %arg9[%c56_64, %c0_65] : memref<72x4xf32, #tpu.memory_space<vmem>>, vector<16x4xf32>
    tpu.vector_store %arg9[%c56_64, %c0_65], %87 {strides = array<i32>} : memref<72x4xf32, #tpu.memory_space<vmem>>, vector<16x4xf32>,
    %c2 = arith.constant 2 : index
    %c0_66 = arith.constant 0 : index
    %89 = vector.load %arg9[%c2, %c0_66] : memref<72x4xf32, #tpu.memory_space<vmem>>, vector<16x4xf32>
    %c11 = arith.constant 11 : index
    %c0_67 = arith.constant 0 : index
    %90 = vector.load %arg9[%c11, %c0_67] : memref<72x4xf32, #tpu.memory_space<vmem>>, vector<16x4xf32>
    %c20 = arith.constant 20 : index
    %c0_68 = arith.constant 0 : index
    %91 = vector.load %arg9[%c20, %c0_68] : memref<72x4xf32, #tpu.memory_space<vmem>>, vector<16x4xf32>
    %c29 = arith.constant 29 : index
    %c0_69 = arith.constant 0 : index
    %92 = vector.load %arg9[%c29, %c0_69] : memref<72x4xf32, #tpu.memory_space<vmem>>, vector<16x4xf32>
    %c38_70 = arith.constant 38 : index
    %c0_71 = arith.constant 0 : index
    %93 = vector.load %arg9[%c38_70, %c0_71] : memref<72x4xf32, #tpu.memory_space<vmem>>, vector<16x4xf32>
    %c47_72 = arith.constant 47 : index
    %c0_73 = arith.constant 0 : index
    %94 = vector.load %arg9[%c47_72, %c0_73] : memref<72x4xf32, #tpu.memory_space<vmem>>, vector<16x4xf32>
    %c56_74 = arith.constant 56 : index
    %c0_75 = arith.constant 0 : index
    %95 = vector.load %arg9[%c56_74, %c0_75] : memref<72x4xf32, #tpu.memory_space<vmem>>, vector<16x4xf32>
    %96 = tpu.concatenate %89, %90, %91, %92, %93, %94, %95 in 1 : vector<16x4xf32>, vector<16x4xf32>, vector<16x4xf32>, vector<16x4xf32>, vector<16x4xf32>, vector<16x4xf32>, vector<16x4xf32> -> vector<16x28xf32>
    %97 = arith.truncf %96 : vector<16x28xf32> to vector<16x28xbf16>
    %c2_76 = arith.constant 2 : index
    %c0_77 = arith.constant 0 : index
    %c0_78 = arith.constant 0 : index
    %98 = vector.load %arg2[%c2_76, %c0_77, %c0_78] : memref<3x28x4xbf16, #tpu.memory_space<vmem>>, vector<1x28x4xbf16>
    %99 = vector.shape_cast %98 : vector<1x28x4xbf16> to vector<28x4xbf16>
    %cst_79 = arith.constant dense<0.000000e+00> : vector<16x4xf32>
    %100 = tpu.matmul %97, %99, %cst_79 {dimension_numbers = #tpu.dot_dimension_numbers<[1], [0], [0], [1], [0, 0, 1, 1], [], []>} : vector<16x28xbf16>, vector<28x4xbf16>, vector<16x4xf32> -> vector<16x4xf32>
    %c2_80 = arith.constant 2 : index
    %c0_81 = arith.constant 0 : index
    %c0_82 = arith.constant 0 : index
    %101 = vector.load %arg3[%c2_80, %c0_81, %c0_82] : memref<3x1x4xf32, #tpu.memory_space<vmem>>, vector<1x1x4xf32>
    %102 = vector.shape_cast %101 : vector<1x1x4xf32> to vector<1x4xf32>
    %103 = vector.broadcast %102 : vector<1x4xf32> to vector<16x4xf32>
    %104 = arith.addf %100, %103 : vector<16x4xf32>
    %cst_83 = arith.constant 0.000000e+00 : f32
    %105 = vector.broadcast %cst_83 : f32 to vector<16x4xf32>
    %106 = arith.cmpf ogt, %104, %105 : vector<16x4xf32>
    %cst_84 = arith.constant 0.000000e+00 : f32
    %107 = vector.broadcast %cst_84 : f32 to vector<16x4xf32>
    %108 = arith.minimumf %104, %107 : vector<16x4xf32>
    %109 = math.exp %108 : vector<16x4xf32>
    %cst_85 = arith.constant 1.000000e+00 : f32
    %110 = vector.broadcast %cst_85 : f32 to vector<16x4xf32>
    %111 = arith.subf %109, %110 : vector<16x4xf32>
    %112 = arith.select %106, %104, %111 : vector<16x4xi1>, vector<16x4xf32>
    %113 = arith.truncf %112 : vector<16x4xf32> to vector<16x4xbf16>
    %c2_86 = arith.constant 2 : index
    %c0_87 = arith.constant 0 : index
    %c0_88 = arith.constant 0 : index
    %114 = vector.load %arg4[%c2_86, %c0_87, %c0_88] : memref<3x4x4xbf16, #tpu.memory_space<vmem>>, vector<1x4x4xbf16>
    %115 = vector.shape_cast %114 : vector<1x4x4xbf16> to vector<4x4xbf16>
    %cst_89 = arith.constant dense<0.000000e+00> : vector<16x4xf32>
    %116 = tpu.matmul %113, %115, %cst_89 {dimension_numbers = #tpu.dot_dimension_numbers<[1], [0], [0], [1], [0, 0, 1, 1], [], []>} : vector<16x4xbf16>, vector<4x4xbf16>, vector<16x4xf32> -> vector<16x4xf32>
    %c2_90 = arith.constant 2 : index
    %c0_91 = arith.constant 0 : index
    %c0_92 = arith.constant 0 : index
    %117 = vector.load %arg5[%c2_90, %c0_91, %c0_92] : memref<3x1x4xf32, #tpu.memory_space<vmem>>, vector<1x1x4xf32>
    %118 = vector.shape_cast %117 : vector<1x1x4xf32> to vector<1x4xf32>
    %119 = vector.broadcast %118 : vector<1x4xf32> to vector<16x4xf32>
    %120 = arith.addf %116, %119 : vector<16x4xf32>
    %121 = arith.addf %87, %120 : vector<16x4xf32>
    %cst_93 = arith.constant 0.000000e+00 : f32
    %122 = vector.broadcast %cst_93 : f32 to vector<16x4xf32>
    %123 = arith.cmpf ogt, %121, %122 : vector<16x4xf32>
    %cst_94 = arith.constant 0.000000e+00 : f32
    %124 = vector.broadcast %cst_94 : f32 to vector<16x4xf32>
    %125 = arith.minimumf %121, %124 : vector<16x4xf32>
    %126 = math.exp %125 : vector<16x4xf32>
    %cst_95 = arith.constant 1.000000e+00 : f32
    %127 = vector.broadcast %cst_95 : f32 to vector<16x4xf32>
    %128 = arith.subf %126, %127 : vector<16x4xf32>
    %129 = arith.select %123, %121, %128 : vector<16x4xi1>, vector<16x4xf32>
    %c56_96 = arith.constant 56 : index
    %c0_97 = arith.constant 0 : index
    %130 = vector.load %arg9[%c56_96, %c0_97] : memref<72x4xf32, #tpu.memory_space<vmem>>, vector<16x4xf32>
    tpu.vector_store %arg9[%c56_96, %c0_97], %129 {strides = array<i32>} : memref<72x4xf32, #tpu.memory_space<vmem>>, vector<16x4xf32>,
    %c53_98 = arith.constant 53 : index
    %c0_99 = arith.constant 0 : index
    %131 = tpu.strided_load %arg9[%c53_98, %c0_99] {strides = array<i32: 2, 1>} : memref<72x4xf32, #tpu.memory_space<vmem>>, vector<8x4xf32>
    %c54_100 = arith.constant 54 : index
    %c0_101 = arith.constant 0 : index
    %132 = tpu.strided_load %arg9[%c54_100, %c0_101] {strides = array<i32: 2, 1>} : memref<72x4xf32, #tpu.memory_space<vmem>>, vector<8x4xf32>
    %c55_102 = arith.constant 55 : index
    %c0_103 = arith.constant 0 : index
    %133 = tpu.strided_load %arg9[%c55_102, %c0_103] {strides = array<i32: 2, 1>} : memref<72x4xf32, #tpu.memory_space<vmem>>, vector<8x4xf32>
    %c56_104 = arith.constant 56 : index
    %c0_105 = arith.constant 0 : index
    %134 = tpu.strided_load %arg9[%c56_104, %c0_105] {strides = array<i32: 2, 1>} : memref<72x4xf32, #tpu.memory_space<vmem>>, vector<8x4xf32>
    %135 = tpu.concatenate %131, %132, %133, %134 in 1 : vector<8x4xf32>, vector<8x4xf32>, vector<8x4xf32>, vector<8x4xf32> -> vector<8x16xf32>
    %136 = arith.truncf %135 : vector<8x16xf32> to vector<8x16xbf16>
    %c0_106 = arith.constant 0 : index
    %c0_107 = arith.constant 0 : index
    %137 = vector.load %arg6[%c0_106, %c0_107] : memref<16x8xbf16, #tpu.memory_space<vmem>>, vector<16x8xbf16>
    %cst_108 = arith.constant dense<0.000000e+00> : vector<8x8xf32>
    %138 = tpu.matmul %136, %137, %cst_108 {dimension_numbers = #tpu.dot_dimension_numbers<[1], [0], [0], [1], [0, 0, 1, 1], [], []>} : vector<8x16xbf16>, vector<16x8xbf16>, vector<8x8xf32> -> vector<8x8xf32>
    %c0_109 = arith.constant 0 : index
    %c0_110 = arith.constant 0 : index
    %139 = vector.load %arg7[%c0_109, %c0_110] : memref<1x8xf32, #tpu.memory_space<vmem>>, vector<1x8xf32>
    %140 = vector.broadcast %139 : vector<1x8xf32> to vector<8x8xf32>
    %141 = arith.addf %138, %140 : vector<8x8xf32>
    %c0_111 = arith.constant 0 : index
    %c0_112 = arith.constant 0 : index
    %c0_113 = arith.constant 0 : index
    %142 = vector.load %arg8[%c0_111, %c0_112, %c0_113] : memref<1x8x8xf32, #tpu.memory_space<vmem>>, vector<1x8x8xf32>
    %143 = vector.shape_cast %142 : vector<1x8x8xf32> to vector<8x8xf32>
    %144 = vector.shape_cast %141 : vector<8x8xf32> to vector<1x8x8xf32>
    tpu.vector_store %arg8[%c0_111, %c0_112, %c0_113], %144 {strides = array<i32>} : memref<1x8x8xf32, #tpu.memory_space<vmem>>, vector<1x8x8xf32>,
    return
  }
  func.func @transform_0(%arg0: i32) -> (i32, i32, i32) {
    %c0_i32 = arith.constant 0 : i32
    %c0_i32_0 = arith.constant 0 : i32
    %c0_i32_1 = arith.constant 0 : i32
    return %arg0, %c0_i32, %c0_i32_0 : i32, i32, i32
  }
  func.func @transform_1(%arg0: i32) -> (i32, i32, i32) {
    %c0_i32 = arith.constant 0 : i32
    %c0_i32_0 = arith.constant 0 : i32
    %c0_i32_1 = arith.constant 0 : i32
    %c0_i32_2 = arith.constant 0 : i32
    return %c0_i32, %c0_i32_0, %c0_i32_1 : i32, i32, i32
  }
  func.func @transform_2(%arg0: i32) -> (i32, i32, i32) {
    %c0_i32 = arith.constant 0 : i32
    %c0_i32_0 = arith.constant 0 : i32
    %c0_i32_1 = arith.constant 0 : i32
    %c0_i32_2 = arith.constant 0 : i32
    return %c0_i32, %c0_i32_0, %c0_i32_1 : i32, i32, i32
  }
  func.func @transform_3(%arg0: i32) -> (i32, i32, i32) {
    %c0_i32 = arith.constant 0 : i32
    %c0_i32_0 = arith.constant 0 : i32
    %c0_i32_1 = arith.constant 0 : i32
    %c0_i32_2 = arith.constant 0 : i32
    return %c0_i32, %c0_i32_0, %c0_i32_1 : i32, i32, i32
  }
  func.func @transform_4(%arg0: i32) -> (i32, i32, i32) {
    %c0_i32 = arith.constant 0 : i32
    %c0_i32_0 = arith.constant 0 : i32
    %c0_i32_1 = arith.constant 0 : i32
    %c0_i32_2 = arith.constant 0 : i32
    return %c0_i32, %c0_i32_0, %c0_i32_1 : i32, i32, i32
  }
  func.func @transform_5(%arg0: i32) -> (i32, i32) {
    %c0_i32 = arith.constant 0 : i32
    %c0_i32_0 = arith.constant 0 : i32
    %c0_i32_1 = arith.constant 0 : i32
    return %c0_i32, %c0_i32_0 : i32, i32
  }
  func.func @transform_6(%arg0: i32) -> (i32, i32) {
    %c0_i32 = arith.constant 0 : i32
    %c0_i32_0 = arith.constant 0 : i32
    %c0_i32_1 = arith.constant 0 : i32
    return %c0_i32, %c0_i32_0 : i32, i32
  }
  func.func @transform_7(%arg0: i32) -> (i32, i32, i32) {
    %c0_i32 = arith.constant 0 : i32
    %c0_i32_0 = arith.constant 0 : i32
    %c0_i32_1 = arith.constant 0 : i32
    return %arg0, %c0_i32, %c0_i32_0 : i32, i32, i32
  }
}

</mosaic_0001>

<bundles_post_ra>
// kernel: tpu_custom_call.1
= control target key start
LH: loop header
LB: loop body
LE: loop exit
PB: predicated region body
PF: predicated region fallthrough
CT: control target
= control target key end

     0   :  { %12 = vsyncpa [#allocation4], 0  ;;  %s1858_s0 = inlined_call_operand.vmem [shape: f32[2,16,4], index: 0, kind: input, shape index: {}]   ;;  %s1859_s1 = inlined_call_operand.vmem [shape: bf16[3,28,4], index: 1, kind: input, shape index: {}]   ;;  %s1860_s2 = inlined_call_operand.vmem [shape: f32[3,1,4], index: 2, kind: input, shape index: {}]   ;;  %s1861_s3 = inlined_call_operand.vmem [shape: bf16[3,4,4], index: 3, kind: input, shape index: {}]   ;;  %s1862_s4 = inlined_call_operand.vmem [shape: f32[3,1,4], index: 4, kind: input, shape index: {}]   ;;  %s1863_s5 = inlined_call_operand.vmem [shape: bf16[16,8], index: 5, kind: input, shape index: {}]   ;;  %s1864_s6 = inlined_call_operand.vmem [shape: f32[1,8], index: 6, kind: input, shape index: {}]   ;;  %s1865_s7 = inlined_call_operand.hbm [shape: f32[2,8,8], index: 7, kind: output, shape index: {}]  }
   0x1   :  { %14 = vsyncpa [#allocation4 + $0x1], 0  ;;  %s1551_s24 = smov 0   ;;  %s1553_s25 = smov 0  }
   0x2   :  { %s1555_s26 = smov 0   ;;  %s1557_s27 = smov 0  }
   0x3 LB: > { %s1572_s28 = sadd.s32 4294967295, %s1500_s27   ;;  %s1146_s29 = sadd.s32 4294967294, %s1500_s27   ;;  %s1500_s27 = sphi %s1557_s27, %s1871_s27   ;;  %s1496_s26 = sphi %s1555_s26, %s1870_s26   ;;  %s1492_s25 = sphi %s1553_s25, %s1869_s25   ;;  %s1488_s24 = sphi %s1551_s24, %s1868_s24  }
   0x4   : > { %s1576_s30 = sadd.s32 1, %s1500_s27   ;;  %s179_s8 = sadd.s32 1, %s1496_s26 }
   0x5   : > { %s176_s9 = ssub.s32 %s1500_s27, %s1576_s30  ;;  %p189_p0 = scmp.ne.s32.totalorder %s1496_s26, %s1492_s25 }
   0x6   : > { %p177_p1 = scmp.eq.s32.totalorder %s176_s9, 0  ;;  %p190_p2 = scmp.eq.s32.totalorder %s1572_s28, 1 }
   0x7   : > { %p195_p3 = scmp.ne.s32.totalorder %s1492_s25, %s1488_s24  ;;  %p196_p4 = scmp.eq.s32.totalorder %s1146_s29, 1 }
   0x8   : > { %s1587_s10 = scalar_select %p177_p1, %s1496_s26, %s179_s8  }
   0x9   : > { %p1589_p5 = por %p190_p2, %p189_p0  ;;  %p1593_p6 = por %p196_p4, %p195_p3 }
   0xa   : > { %p1149_p7 = scmp.ge.s32.totalorder %s1500_s27, 1  ;;  %p240_p8 = scmp.lt.s32.totalorder %s1500_s27, 3 }
   0xc   : > { %p241_p9 = pnand %p1149_p7, %p240_p8 }
   0xd   : > { %p272_p10 = scmp.lt.s32.totalorder (!%p241_p9), %s1572_s28, 1  ;;  %vm278_vm0 = vcmask (!%p241_p9), 31744   ;;  %v1502_v0 = vmov (!%p241_p9), 0.0   ;;  %v1407_v3 = vld [vmem:[%s1859_s1] sm:$0xff] (!%p241_p9)   ;;  %v1408_v4 = vld [vmem:[%s1859_s1 + $0x8] sm:$0x3f] (!%p241_p9)  }
   0xe   : > { %244 = sbr.rel (%p241_p9) target bundleno = 2207 (0x89f), region = 48  ;;  %285 = vst.msk [vmem:[#allocation2 + $0x30] sm:$0xff] (!%p241_p9), %vm278_vm0, %v1502_v0  ;;  %279 = vst.msk [vmem:[#allocation2] sm:$0xff] (!%p241_p9), %vm278_vm0, %v1502_v0  ;;  %1222 = vmatprep.subr.bf16.mxu0 (!%p241_p9), %v1502_v0  ;;  %1230 = vmatprep.subr.bf16.mxu1 (!%p241_p9), %v1502_v0  ;;  %vm396_vm1 = vcmask (!%p241_p9), 1045504   ;;  %s1503_s22 = smov (!%p241_p9), 4   ;;  %vm1504_vm2 = vmmov (!%p241_p9), 0  }
   0xf   : > { %280 = vst.msk [vmem:[#allocation2 + $0x8] sm:$0xff] (!%p241_p9), %vm278_vm0, %v1502_v0  ;;  %281 = vst.msk [vmem:[#allocation2 + $0x10] sm:$0xff] (!%p241_p9), %vm278_vm0, %v1502_v0  ;;  %1223 = vmatpush3.bf16.msra.mxu0 (!%p241_p9), %v1407_v3  ;;  %v398_v8 = vsel (!%p241_p9), %vm396_vm1, %v1408_v4, 0  ;;  %1226 = vmatprep.mubr.msk.bf16.mxu0 (!%p241_p9), %vm1504_vm2, %v1502_v0  ;;  %s1505_s23 = smov (!%p241_p9), 12   ;;  %s1506_s29 = smov (!%p241_p9), 8   ;;  %vm354_vm3 = vcmask (!%p241_p9), 64512  }
  0x10   : > { %282 = vst.msk [vmem:[#allocation2 + $0x18] sm:$0xff] (!%p241_p9), %vm278_vm0, %v1502_v0  ;;  %283 = vst.msk [vmem:[#allocation2 + $0x20] sm:$0xff] (!%p241_p9), %vm278_vm0, %v1502_v0  ;;  %1224 = vmatprep.subr.bf16.mxu0 (!%p241_p9), %v1502_v0  ;;  %1232 = vmatprep.mubr.msk.bf16.mxu1 (!%p241_p9), %vm1504_vm2, %v1502_v0  ;;  %s1507_s8 = smov (!%p241_p9), 16   ;;  %s1508_s9 = smov (!%p241_p9), 20   ;;  %vm357_vm4 = vcmask (!%p241_p9), 97280   ;;  %vm360_vm5 = vcmask (!%p241_p9), 130048  }
  0x11   : > { %284 = vst.msk [vmem:[#allocation2 + $0x28] sm:$0xff] (!%p241_p9), %vm278_vm0, %v1502_v0  ;;  %vm363_vm6 = vcmask (!%p241_p9), 162816   ;;  %vm366_vm7 = vcmask (!%p241_p9), 195584   ;;  %vm392_vm8 = vcmask (!%p241_p9), 228352   ;;  %v454_v57 = vld [vmem:[%s1861_s3] sm:$0x3] (!%p241_p9) }
  0x12   : > { %vm465_vm9 = vcmask (!%p241_p9), 1041408   ;;  %v1153_v59 = vld [vmem:[%s1860_s2] ss:$0 sm:$0xff] (!%p241_p9)  ;;  %s1510_s20 = smov (!%p241_p9), [#allocation3]  }
  0x13   : > { %1225 = vmatpush3.bf16.msra.mxu0 (!%p241_p9), %v398_v8  ;;  %v467_v58 = vsel (!%p241_p9), %vm465_vm9, %v454_v57, 0  ;;  %s1442_s21 = sshll.u32 (!%p241_p9), %s1510_s20, 4  ;;  %s1443_s21 = int_to_ptr.vmem [resolvable:$false] %s1442_s21 }
  0x14   : > { %1244 = vmatprep.subr.bf16.mxu0 (!%p241_p9), %v1502_v0  ;;  %1231 = vmatpush3.bf16.msra.mxu1 (!%p241_p9), %v467_v58 }
  0x15   : > { %s273_s13 = scalar_select %p272_p10, %s1572_s28, 1  ;;  %1236 = vmatprep.subr.bf16.mxu1 %v1502_v0 }
  0x17   : > { %s1204_s14 = sshll.u32 %s273_s13, 4  ;;  %s1509_s13 = smov 24  }
  0x18   : > { %s276_s17 = scalar_lea.vmem %s1858_s0, %s1204_s14  ;;  %s1444_s14 = scalar_lea.vmem %s1443_s21, 256 }
  0x19   : > { %v1620_v1 = vld [vmem:[%s276_s17] sm:$0xff]  ;;  %v1622_v2 = vld [vmem:[%s276_s17 + $0x8] sm:$0xff] }
  0x1a   : > { %288 = vst.msk [vmem:[#allocation2 + $0x38] sm:$0xff] %vm278_vm0, %v1620_v1  ;;  %289 = vst.msk [vmem:[#allocation2 + $0x40] sm:$0xff] %vm278_vm0, %v1622_v2 }
  0x21   : > { %v292_v5 = vld [vmem:[#allocation2 + $0x33] sm:$0xff]  ;;  %v293_v6 = vld [vmem:[#allocation2 + $0x3b] sm:$0xff] }
  0x22   : > { %v296_v7 = vld [vmem:[#allocation2 + $0x35] sm:$0xff]  ;;  %v1317_v9 = vpack.i.bf16 %v293_v6, %v292_v5  ;;  %v297_v10 = vld [vmem:[#allocation2 + $0x3d] sm:$0xff] }
  0x23   : > { %v294_v11 = vld [vmem:[#allocation2 + $0x34] sm:$0xff]  ;;  %v295_v12 = vld [vmem:[#allocation2 + $0x3c] sm:$0xff]  ;;  %v1327_v13 = vpack.i.bf16 %v297_v10, %v296_v7 }
  0x24   : > { %v298_v14 = vld [vmem:[#allocation2 + $0x36] sm:$0xff]  ;;  %v299_v15 = vld [vmem:[#allocation2 + $0x3e] sm:$0xff]  ;;  %1318 = vrot.lane.b32.xlu0 %v1317_v9, %s1503_s22  ;;  %v1322_v16 = vpack.i.bf16 %v295_v12, %v294_v11 }
  0x25   : > { %1328 = vrot.lane.b32.xlu1 %v1327_v13, %s1505_s23  ;;  %v1332_v17 = vpack.i.bf16 %v299_v15, %v298_v14  ;;  %v300_v18 = vld [vmem:[#allocation2 + $0x37] sm:$0xff]  ;;  %v301_v19 = vld [vmem:[#allocation2 + $0x3f] sm:$0xff] }
  0x26   : > { %v302_v20 = vld [vmem:[#allocation2 + $0x38] sm:$0xff]  ;;  %v303_v21 = vld [vmem:[#allocation2 + $0x40] sm:$0xff]  ;;  %v1337_v22 = vpack.i.bf16 %v301_v19, %v300_v18 }
  0x27   : > { %v1342_v23 = vpack.i.bf16 %v303_v21, %v302_v20  ;;  %v290_v28 = vld [vmem:[#allocation2 + $0x32] sm:$0xff]  ;;  %v291_v29 = vld [vmem:[#allocation2 + $0x3a] sm:$0xff] }
  0x28   : > { %1323 = vrot.lane.b32.xlu0 %v1322_v16, %s1506_s29  ;;  %v1159_v16 = vld [vmem:[%s1862_s4] ss:$0 sm:$0xff] }
  0x29   : > { %1333 = vrot.lane.b32.xlu1 %v1332_v17, %s1507_s8 }
  0x2c   : > { %1338 = vrot.lane.b32.xlu0 %v1337_v22, %s1508_s9 }
  0x2d   : > { %1343 = vrot.lane.b32.xlu1 %v1342_v23, %s1509_s13 }
  0x96   : > { %v1319_v24 = vpop.permute.xlu0 %1318 }
  0x97   : > { %v1329_v25 = vpop.permute.xlu1 %1328  ;;  %v1321_v26 = vunpack.i.h.bf16 %v1319_v24  ;;  %v1320_v27 = vunpack.i.l.bf16 %v1319_v24 }
  0x98   : > { %v1331_v31 = vunpack.i.h.bf16 %v1329_v25  ;;  %v1330_v32 = vunpack.i.l.bf16 %v1329_v25 }
  0x99   : > { %v352_v36 = vsel %vm278_vm0, %v290_v28, %v1320_v27  ;;  %v353_v37 = vsel %vm278_vm0, %v291_v29, %v1321_v26 }
  0x9a   : > { %v1324_v30 = vpop.permute.xlu0 %1323 }
  0x9b   : > { %v1326_v33 = vunpack.i.h.bf16 %v1324_v30  ;;  %v1325_v34 = vunpack.i.l.bf16 %v1324_v30  ;;  %v1334_v35 = vpop.permute.xlu1 %1333 }
  0x9c   : > { %v1336_v38 = vunpack.i.h.bf16 %v1334_v35  ;;  %v1335_v39 = vunpack.i.l.bf16 %v1334_v35  ;;  %v528_v35 = vld [vmem:[#allocation2 + $0x29] sm:$0xff] }
  0x9d   : > { %v355_v40 = vsel %vm354_vm3, %v352_v36, %v1325_v34  ;;  %v356_v41 = vsel %vm354_vm3, %v353_v37, %v1326_v33  ;;  %v530_v34 = vld [vmem:[#allocation2 + $0x2c] sm:$0xff]  ;;  %v1410_v36 = vld [vmem:[%s1859_s1 + $0x18] sm:$0x3f]  }
  0x9e   : > { %v358_v42 = vsel %vm357_vm4, %v355_v40, %v1330_v32  ;;  %v359_v43 = vsel %vm357_vm4, %v356_v41, %v1331_v31  ;;  %v1339_v44 = vpop.permute.xlu0 %1338  ;;  %v629_v41 = vsel %vm396_vm1, %v1410_v36, 0 }
  0x9f   : > { %v361_v45 = vsel %vm360_vm5, %v358_v42, %v1335_v39  ;;  %v362_v46 = vsel %vm360_vm5, %v359_v43, %v1336_v38  ;;  %v1341_v47 = vunpack.i.h.bf16 %v1339_v44  ;;  %v1340_v48 = vunpack.i.l.bf16 %v1339_v44  ;;  %v1344_v49 = vpop.permute.xlu1 %1343  ;;  %v1694_v42 = vld [vmem:[#allocation2 + $0x2f] sm:$0xff] }
  0xa0   : > { %v1346_v50 = vunpack.i.h.bf16 %v1344_v49  ;;  %v1345_v51 = vunpack.i.l.bf16 %v1344_v49 }
  0xa1   : > { %v364_v52 = vsel %vm363_vm6, %v361_v45, %v1340_v48  ;;  %v365_v53 = vsel %vm363_vm6, %v362_v46, %v1341_v47 }
  0xa2   : > { %v367_v54 = vsel %vm366_vm7, %v364_v52, %v1345_v51  ;;  %v368_v55 = vsel %vm366_vm7, %v365_v53, %v1346_v50 }
  0xa3   : > { %v369_v56 = vpack.c.bf16 %v368_v55, %v367_v54  ;;  %v1704_v55 = vld [vmem:[#allocation2 + $0x26] sm:$0xff] }
  0xa5   : > { %1227 = vmatmul.mubr.msk.bf16.vlgmr.msra.gmra.mrb[0].mxu0 %vm392_vm8, %v369_v56  ;;  %v1706_v56 = vld [vmem:[#allocation2 + $0x2e] sm:$0xff] }
  0xa6   : > { %1246 = vmatprep.mubr.msk.bf16.mxu0 %vm1504_vm2, %v1502_v0 }
 0x178   : > { %v434_v60 = vpop.f32.mrb[0].mxu0 }
 0x179   : > { %v435_v61 = vadd.f32 %v1153_v59, %v434_v60  ;;  %v1228_v62 = vpop.f32.mrb[1].mxu0 }
 0x17a   : > { %v437_v63 = vpop.f32.mrb[2].mxu0 }
 0x17b   : > { %v443_v3 = vmin.f32 %v435_v61, 0.0  ;;  %v438_v4 = vadd.f32 %v1153_v59, %v437_v63  ;;  %v1229_v5 = vpop.f32.mrb[3].mxu0  ;;  %vm441_vm10 = vcmp.gt.f32.partialorder %v435_v61, 0.0 }
 0x17d   : > { %v445_v6 = vmul.f32 1.442695, %v443_v3  ;;  %v444_v7 = vmin.f32 %v438_v4, 0.0  ;;  %vm442_vm11 = vcmp.gt.f32.partialorder %v438_v4, 0.0 }
 0x17f   : > { %1414 = vpow2.f32 %v445_v6  ;;  %v447_v8 = vmul.f32 1.442695, %v444_v7 }
 0x181   : > { %1416 = vpow2.f32 %v447_v8 }
 0x189   : > { %v1415_v9 = vpop.eup %1414 }
 0x18a   : > { %v1157_v10 = vadd.f32 -1.0, %v1415_v9 }
 0x18b   : > { %v1417_v11 = vpop.eup %1416 }
 0x18c   : > { %v1158_v12 = vadd.f32 -1.0, %v1417_v11  ;;  %v451_v13 = vsel %vm441_vm10, %v435_v61, %v1157_v10 }
 0x18e   : > { %v452_v14 = vsel %vm442_vm11, %v438_v4, %v1158_v12 }
 0x18f   : > { %v453_v15 = vpack.c.bf16 %v452_v14, %v451_v13 }
 0x191   : > { %1233 = vmatmul.mubr.msk.bf16.vlgmr.msra.gmra.mrb[0].mxu1 %vm278_vm0, %v453_v15 }
 0x192   : > { %1240 = vmatprep.mubr.msk.bf16.mxu1 %vm1504_vm2, %v1502_v0 }
 0x264   : > { %v503_v17 = vpop.f32.mrb[0].mxu1 }
 0x265   : > { %v504_v18 = vadd.f32 %v1159_v16, %v503_v17  ;;  %v1234_v19 = vpop.f32.mrb[1].mxu1 }
 0x266   : > { %v506_v20 = vpop.f32.mrb[2].mxu1 }
 0x267   : > { %v510_v21 = vadd.f32 %v504_v18, %v1620_v1  ;;  %v507_v22 = vadd.f32 %v1159_v16, %v506_v20  ;;  %v1235_v23 = vpop.f32.mrb[3].mxu1 }
 0x269   : > { %v514_v24 = vmin.f32 %v510_v21, 0.0  ;;  %v511_v25 = vadd.f32 %v507_v22, %v1622_v2  ;;  %vm512_vm12 = vcmp.gt.f32.partialorder %v510_v21, 0.0  ;;  %v1409_v2 = vld [vmem:[%s1859_s1 + $0x10] sm:$0xff]  }
 0x26a   : > { %1237 = vmatpush3.bf16.msra.mxu1 %v1409_v2 }
 0x26b   : > { %v516_v26 = vmul.f32 1.442695, %v514_v24  ;;  %v515_v27 = vmin.f32 %v511_v25, 0.0  ;;  %vm513_vm13 = vcmp.gt.f32.partialorder %v511_v25, 0.0  ;;  %1238 = vmatprep.subr.bf16.mxu1 %v1502_v0 }
 0x26d   : > { %1418 = vpow2.f32 %v516_v26  ;;  %v518_v28 = vmul.f32 1.442695, %v515_v27  ;;  %v1174_v26 = vld [vmem:[%s1861_s3 + $0x2] sm:$0x3] }
 0x26e   : > { %1239 = vmatpush3.bf16.msra.mxu1 %v629_v41  ;;  %v699_v27 = vsel %vm465_vm9, %v1174_v26, 0  ;;  %v759_v26 = vld [vmem:[#allocation2 + $0xa] sm:$0xff] }
 0x26f   : > { %1420 = vpow2.f32 %v518_v28  ;;  %1250 = vmatprep.subr.bf16.mxu1 %v1502_v0  ;;  %1245 = vmatpush3.bf16.msra.mxu0 %v699_v27  ;;  %v1168_v28 = vld [vmem:[%s1860_s2 + $0x1] ss:$0 sm:$0xff] }
 0x270   : > { %1258 = vmatprep.subr.bf16.mxu0 %v1502_v0 }
 0x277   : > { %v1419_v29 = vpop.eup %1418 }
 0x278   : > { %v1161_v30 = vadd.f32 -1.0, %v1419_v29 }
 0x279   : > { %v1421_v31 = vpop.eup %1420 }
 0x27a   : > { %v1678_v32 = vsel %vm512_vm12, %v510_v21, %v1161_v30  ;;  %v1162_v33 = vadd.f32 -1.0, %v1421_v31 }
 0x27b   : > { %524 = vst.msk [vmem:[#allocation2 + $0x38] sm:$0xff] %vm278_vm0, %v1678_v32 }
 0x27c   : > { %v1682_v1 = vsel %vm513_vm13, %v511_v25, %v1162_v33 }
 0x27d   : > { %525 = vst.msk [vmem:[#allocation2 + $0x40] sm:$0xff] %vm278_vm0, %v1682_v1 }
 0x282   : > { %v531_v37 = vld [vmem:[#allocation2 + $0x34] sm:$0xff] }
 0x283   : > { %v529_v38 = vld [vmem:[#allocation2 + $0x31] sm:$0xff]  ;;  %v1352_v39 = vpack.i.bf16 %v531_v37, %v530_v34 }
 0x284   : > { %v1347_v40 = vpack.i.bf16 %v529_v38, %v528_v35  ;;  %v533_v43 = vld [vmem:[#allocation2 + $0x37] sm:$0xff]  ;;  %v539_v49 = vld [vmem:[#allocation2 + $0x40] sm:$0xff] }
 0x285   : > { %v535_v44 = vld [vmem:[#allocation2 + $0x3a] sm:$0xff]  ;;  %1353 = vrot.lane.b32.xlu1 %v1352_v39, %s1506_s29  ;;  %v534_v45 = vld [vmem:[#allocation2 + $0x32] sm:$0xff]  ;;  %v1357_v46 = vpack.i.bf16 %v533_v43, %v1694_v42 }
 0x286   : > { %1348 = vrot.lane.b32.xlu0 %v1347_v40, %s1503_s22  ;;  %v1362_v47 = vpack.i.bf16 %v535_v44, %v534_v45  ;;  %v537_v48 = vld [vmem:[#allocation2 + $0x3d] sm:$0xff]  ;;  %v536_v50 = vld [vmem:[#allocation2 + $0x35] sm:$0xff] }
 0x287   : > { %v538_v51 = vld [vmem:[#allocation2 + $0x38] sm:$0xff]  ;;  %v1367_v52 = vpack.i.bf16 %v537_v48, %v536_v50 }
 0x288   : > { %v1372_v53 = vpack.i.bf16 %v539_v49, %v538_v51  ;;  %v761_v48 = vld [vmem:[#allocation2 + $0x13] sm:$0xff]  ;;  %v763_v51 = vld [vmem:[#allocation2 + $0x1c] sm:$0xff] }
 0x289   : > { %1363 = vrot.lane.b32.xlu1 %v1362_v47, %s1507_s8  ;;  %v760_v47 = vld [vmem:[#allocation2 + $0xb] sm:$0xff]  ;;  %v762_v50 = vld [vmem:[#allocation2 + $0x14] sm:$0xff] }
 0x28a   : > { %1358 = vrot.lane.b32.xlu0 %v1357_v46, %s1505_s23  ;;  %v1377_v49 = vpack.i.bf16 %v761_v48, %v760_v47 }
 0x28d   : > { %1373 = vrot.lane.b32.xlu1 %v1372_v53, %s1509_s13  ;;  %v764_v53 = vld [vmem:[#allocation2 + $0x1d] sm:$0xff] }
 0x28e   : > { %1368 = vrot.lane.b32.xlu0 %v1367_v52, %s1508_s9  ;;  %v1382_v52 = vpack.i.bf16 %v763_v51, %v762_v50 }
 0x291   : > { %1383 = vrot.lane.b32.xlu1 %v1382_v52, %s1506_s29 }
 0x292   : > { %1378 = vrot.lane.b32.xlu0 %v1377_v49, %s1503_s22 }
 0x2f7   : > { %v1354_v54 = vpop.permute.xlu1 %1353 }
 0x2f8   : > { %v1349_v57 = vpop.permute.xlu0 %1348  ;;  %v1356_v60 = vunpack.i.h.bf16 %v1354_v54  ;;  %v1355_v61 = vunpack.i.l.bf16 %v1354_v54  ;;  %v765_v54 = vld [vmem:[#allocation2 + $0x25] sm:$0xff] }
 0x2f9   : > { %v1351_v58 = vunpack.i.h.bf16 %v1349_v57  ;;  %v1350_v59 = vunpack.i.l.bf16 %v1349_v57  ;;  %v1387_v57 = vpack.i.bf16 %v765_v54, %v764_v53  ;;  %v1191_v54 = vld [vmem:[%s1861_s3 + $0x4] sm:$0x3] }
 0x2fb   : > { %v589_v62 = vsel %vm278_vm0, %v1706_v56, %v1351_v58  ;;  %v588_v63 = vsel %vm278_vm0, %v1704_v55, %v1350_v59  ;;  %v1364_v4 = vpop.permute.xlu1 %1363  ;;  %v1392_v58 = vpack.i.bf16 %v1706_v56, %v1704_v55  ;;  %1388 = vrot.lane.b32.xlu0 %v1387_v57, %s1505_s23  ;;  %v1411_v59 = vld [vmem:[%s1859_s1 + $0x20] sm:$0xff]   ;;  %v931_v57 = vsel %vm465_vm9, %v1191_v54, 0 }
 0x2fc   : > { %v1359_v3 = vpop.permute.xlu0 %1358  ;;  %v590_v7 = vsel %vm354_vm3, %v588_v63, %v1355_v61  ;;  %v591_v8 = vsel %vm354_vm3, %v589_v62, %v1356_v60  ;;  %v1366_v9 = vunpack.i.h.bf16 %v1364_v4  ;;  %v1365_v10 = vunpack.i.l.bf16 %v1364_v4  ;;  %v1176_v60 = vld [vmem:[%s1862_s4 + $0x1] ss:$0 sm:$0xff] }
 0x2fd   : > { %v1361_v5 = vunpack.i.h.bf16 %v1359_v3  ;;  %v1360_v6 = vunpack.i.l.bf16 %v1359_v3  ;;  %1393 = vrot.lane.b32.xlu1 %v1392_v58, %s1507_s8  ;;  %v1185_v58 = vld [vmem:[%s1860_s2 + $0x2] ss:$0 sm:$0xff] }
 0x2ff   : > { %v592_v11 = vsel %vm357_vm4, %v590_v7, %v1360_v6  ;;  %v593_v12 = vsel %vm357_vm4, %v591_v8, %v1361_v5  ;;  %v1374_v14 = vpop.permute.xlu1 %1373 }
 0x300   : > { %v1369_v13 = vpop.permute.xlu0 %1368  ;;  %v1376_v17 = vunpack.i.h.bf16 %v1374_v14  ;;  %v1375_v18 = vunpack.i.l.bf16 %v1374_v14  ;;  %v595_v19 = vsel %vm360_vm5, %v593_v12, %v1366_v9  ;;  %v594_v20 = vsel %vm360_vm5, %v592_v11, %v1365_v10 }
 0x301   : > { %v1371_v15 = vunpack.i.h.bf16 %v1369_v13  ;;  %v1370_v16 = vunpack.i.l.bf16 %v1369_v13 }
 0x303   : > { %v596_v21 = vsel %vm363_vm6, %v594_v20, %v1370_v16  ;;  %v597_v22 = vsel %vm363_vm6, %v595_v19, %v1371_v15 }
 0x304   : > { %v598_v23 = vsel %vm366_vm7, %v596_v21, %v1375_v18  ;;  %v599_v24 = vsel %vm366_vm7, %v597_v22, %v1376_v17  ;;  %v1379_v21 = vpop.permute.xlu0 %1378 }
 0x305   : > { %v600_v25 = vpack.c.bf16 %v599_v24, %v598_v23  ;;  %v1381_v22 = vunpack.i.h.bf16 %v1379_v21  ;;  %v1380_v23 = vunpack.i.l.bf16 %v1379_v21  ;;  %v1384_v24 = vpop.permute.xlu1 %1383 }
 0x306   : > { %v1386_v27 = vunpack.i.h.bf16 %v1384_v24 }
 0x307   : > { %1241 = vmatmul.mubr.msk.bf16.vlgmr.msra.gmra.mrb[4].mxu1 %vm392_vm8, %v600_v25  ;;  %v758_v25 = vld [vmem:[#allocation2 + $0x2] sm:$0xff] }
 0x308   : > { %1254 = vmatprep.mubr.msk.bf16.mxu1 %vm1504_vm2, %v1502_v0  ;;  %1251 = vmatpush3.bf16.msra.mxu1 %v1411_v59 }
 0x309   : > { %1252 = vmatprep.subr.bf16.mxu1 %v1502_v0 }
 0x3da   : > { %v665_v29 = vpop.f32.mrb[4].mxu1 }
 0x3db   : > { %v666_v30 = vadd.f32 %v1168_v28, %v665_v29  ;;  %v1242_v31 = vpop.f32.mrb[5].mxu1  ;;  %v1389_v29 = vpop.permute.xlu0 %1388 }
 0x3dc   : > { %v668_v33 = vpop.f32.mrb[6].mxu1  ;;  %v1391_v31 = vunpack.i.h.bf16 %v1389_v29 }
 0x3dd   : > { %v674_v2 = vmin.f32 %v666_v30, 0.0  ;;  %v669_v34 = vadd.f32 %v1168_v28, %v668_v33  ;;  %v1243_v35 = vpop.f32.mrb[7].mxu1  ;;  %vm672_vm14 = vcmp.gt.f32.partialorder %v666_v30, 0.0  ;;  %v1385_v28 = vunpack.i.l.bf16 %v1384_v24 }
 0x3de   : > { %v1390_v33 = vunpack.i.l.bf16 %v1389_v29 }
 0x3df   : > { %v676_v36 = vmul.f32 1.442695, %v674_v2  ;;  %v675_v37 = vmin.f32 %v669_v34, 0.0  ;;  %vm673_vm15 = vcmp.gt.f32.partialorder %v669_v34, 0.0  ;;  %v1394_v2 = vpop.permute.xlu1 %1393 }
 0x3e1   : > { %1422 = vpow2.f32 %v676_v36  ;;  %v678_v38 = vmul.f32 1.442695, %v675_v37  ;;  %v1396_v36 = vunpack.i.h.bf16 %v1394_v2  ;;  %v1395_v37 = vunpack.i.l.bf16 %v1394_v2 }
 0x3e3   : > { %1424 = vpow2.f32 %v678_v38 }
 0x3eb   : > { %v1423_v39 = vpop.eup %1422 }
 0x3ec   : > { %v1172_v40 = vadd.f32 -1.0, %v1423_v39 }
 0x3ed   : > { %v1425_v41 = vpop.eup %1424 }
 0x3ee   : > { %v1173_v43 = vadd.f32 -1.0, %v1425_v41  ;;  %v682_v44 = vsel %vm672_vm14, %v666_v30, %v1172_v40  ;;  %v821_v30 = vsel %vm278_vm0, %v759_v26, %v1381_v22 }
 0x3f0   : > { %v683_v45 = vsel %vm673_vm15, %v669_v34, %v1173_v43  ;;  %v823_v34 = vsel %vm354_vm3, %v821_v30, %v1386_v27 }
 0x3f1   : > { %v684_v46 = vpack.c.bf16 %v683_v45, %v682_v44  ;;  %v825_v39 = vsel %vm357_vm4, %v823_v34, %v1391_v31 }
 0x3f2   : > { %v827_v45 = vsel %vm360_vm5, %v825_v39, %v1396_v36 }
 0x3f3   : > { %1247 = vmatmul.mubr.msk.bf16.vlgmr.msra.gmra.mrb[4].mxu0 %vm278_vm0, %v684_v46 }
 0x3f4   : > { %1260 = vmatprep.mubr.msk.bf16.mxu0 %vm1504_vm2, %v1502_v0  ;;  %1259 = vmatpush3.bf16.msra.mxu0 %v931_v57 }
 0x4c6   : > { %v735_v61 = vpop.f32.mrb[4].mxu0 }
 0x4c7   : > { %v736_v62 = vadd.f32 %v1176_v60, %v735_v61  ;;  %v1248_v63 = vpop.f32.mrb[5].mxu0 }
 0x4c8   : > { %v738_v3 = vpop.f32.mrb[6].mxu0 }
 0x4c9   : > { %v742_v55 = vadd.f32 %v736_v62, %v1678_v32  ;;  %v739_v56 = vadd.f32 %v1176_v60, %v738_v3  ;;  %v1249_v4 = vpop.f32.mrb[7].mxu0  ;;  %v1412_v32 = vld [vmem:[%s1859_s1 + $0x28] sm:$0x3f]  }
 0x4ca   : > { %v861_v15 = vsel %vm396_vm1, %v1412_v32, 0 }
 0x4cb   : > { %v746_v5 = vmin.f32 %v742_v55, 0.0  ;;  %v743_v6 = vadd.f32 %v739_v56, %v1682_v1  ;;  %vm744_vm10 = vcmp.gt.f32.partialorder %v742_v55, 0.0  ;;  %1253 = vmatpush3.bf16.msra.mxu1 %v861_v15 }
 0x4cc   : > { %1264 = vmatprep.subr.bf16.mxu1 %v1502_v0 }
 0x4cd   : > { %v748_v7 = vmul.f32 1.442695, %v746_v5  ;;  %v747_v8 = vmin.f32 %v743_v6, 0.0  ;;  %vm745_vm11 = vcmp.gt.f32.partialorder %v743_v6, 0.0 }
 0x4cf   : > { %1426 = vpow2.f32 %v748_v7  ;;  %v750_v9 = vmul.f32 1.442695, %v747_v8 }
 0x4d1   : > { %1428 = vpow2.f32 %v750_v9 }
 0x4d9   : > { %v1427_v10 = vpop.eup %1426 }
 0x4da   : > { %v1178_v11 = vadd.f32 -1.0, %v1427_v10 }
 0x4db   : > { %v1429_v12 = vpop.eup %1428 }
 0x4dc   : > { %v1751_v13 = vsel %vm744_vm10, %v742_v55, %v1178_v11  ;;  %v1179_v14 = vadd.f32 -1.0, %v1429_v12  ;;  %v1413_v12 = vld [vmem:[%s1863_s5] sm:$0xff]  }
 0x4dd   : > { %756 = vst.msk [vmem:[#allocation2 + $0x38] sm:$0xff] %vm278_vm0, %v1751_v13 }
 0x4de   : > { %v1758_v1 = vsel %vm745_vm11, %v743_v6, %v1179_v14  ;;  %v1193_v14 = vld [vmem:[%s1862_s4 + $0x2] ss:$0 sm:$0xff] }
 0x4df   : > { %757 = vst.msk [vmem:[#allocation2 + $0x40] sm:$0xff] %vm278_vm0, %v1758_v1 }
 0x4e4   : > { %v769_v16 = vld [vmem:[#allocation2 + $0x37] sm:$0xff] }
 0x4e5   : > { %v1397_v17 = vpack.i.bf16 %v769_v16, %v1694_v42  ;;  %v770_v18 = vld [vmem:[#allocation2 + $0x38] sm:$0xff]  ;;  %v820_v42 = vsel %vm278_vm0, %v758_v25, %v1380_v23 }
 0x4e6   : > { %v771_v19 = vld [vmem:[#allocation2 + $0x40] sm:$0xff]  ;;  %v822_v35 = vsel %vm354_vm3, %v820_v42, %v1385_v28 }
 0x4e7   : > { %1398 = vrot.lane.b32.xlu0 %v1397_v17, %s1508_s9  ;;  %v1402_v20 = vpack.i.bf16 %v771_v19, %v770_v18  ;;  %v824_v38 = vsel %vm357_vm4, %v822_v35, %v1390_v33 }
 0x4e8   : > { %v826_v44 = vsel %vm360_vm5, %v824_v38, %v1395_v37 }
 0x4e9   : > { %1403 = vrot.lane.b32.xlu1 %v1402_v20, %s1509_s13 }
 0x559   : > { %v1399_v40 = vpop.permute.xlu0 %1398 }
 0x55a   : > { %v1401_v41 = vunpack.i.h.bf16 %v1399_v40  ;;  %v1400_v43 = vunpack.i.l.bf16 %v1399_v40  ;;  %v1197_v40 = vld [vmem:[%s1864_s6] ss:$0 sm:$0xff] }
 0x55b   : > { %v1404_v46 = vpop.permute.xlu1 %1403 }
 0x55c   : > { %v829_v47 = vsel %vm363_vm6, %v827_v45, %v1401_v41  ;;  %v828_v48 = vsel %vm363_vm6, %v826_v44, %v1400_v43  ;;  %v1406_v49 = vunpack.i.h.bf16 %v1404_v46  ;;  %v1405_v50 = vunpack.i.l.bf16 %v1404_v46 }
 0x55e   : > { %v831_v51 = vsel %vm366_vm7, %v829_v47, %v1406_v49  ;;  %v830_v52 = vsel %vm366_vm7, %v828_v48, %v1405_v50 }
 0x55f   : > { %v832_v53 = vpack.c.bf16 %v831_v51, %v830_v52 }
 0x561   : > { %1255 = vmatmul.mubr.msk.bf16.vlgmr.msra.gmra.mrb[8].mxu1 %vm392_vm8, %v832_v53 }
 0x562   : > { %1266 = vmatprep.mubr.msk.bf16.mxu1 %vm1504_vm2, %v1502_v0  ;;  %1265 = vmatpush3.bf16.msra.mxu1 %v1413_v12 }
 0x634   : > { %v897_v59 = vpop.f32.mrb[8].mxu1 }
 0x635   : > { %v898_v60 = vadd.f32 %v1185_v58, %v897_v59  ;;  %v1256_v61 = vpop.f32.mrb[9].mxu1 }
 0x636   : > { %v900_v62 = vpop.f32.mrb[10].mxu1 }
 0x637   : > { %v906_v63 = vmin.f32 %v898_v60, 0.0  ;;  %v901_v3 = vadd.f32 %v1185_v58, %v900_v62  ;;  %v1257_v55 = vpop.f32.mrb[11].mxu1  ;;  %vm904_vm1 = vcmp.gt.f32.partialorder %v898_v60, 0.0 }
 0x639   : > { %v908_v56 = vmul.f32 1.442695, %v906_v63  ;;  %v907_v0 = vmin.f32 %v901_v3, 0.0  ;;  %vm905_vm2 = vcmp.gt.f32.partialorder %v901_v3, 0.0 }
 0x63b   : > { %1430 = vpow2.f32 %v908_v56  ;;  %v910_v4 = vmul.f32 1.442695, %v907_v0 }
 0x63d   : > { %1432 = vpow2.f32 %v910_v4 }
 0x645   : > { %v1431_v5 = vpop.eup %1430 }
 0x646   : > { %v1189_v6 = vadd.f32 -1.0, %v1431_v5 }
 0x647   : > { %v1433_v7 = vpop.eup %1432 }
 0x648   : > { %v1190_v8 = vadd.f32 -1.0, %v1433_v7  ;;  %v914_v9 = vsel %vm904_vm1, %v898_v60, %v1189_v6 }
 0x64a   : > { %v915_v10 = vsel %vm905_vm2, %v901_v3, %v1190_v8 }
 0x64b   : > { %v916_v11 = vpack.c.bf16 %v915_v10, %v914_v9 }
 0x64d   : > { %1261 = vmatmul.mubr.msk.bf16.vlgmr.msra.gmra.mrb[8].mxu0 %vm278_vm0, %v916_v11 }
 0x720   : > { %v967_v32 = vpop.f32.mrb[8].mxu0 }
 0x721   : > { %v968_v15 = vadd.f32 %v1193_v14, %v967_v32  ;;  %v1262_v16 = vpop.f32.mrb[9].mxu0 }
 0x722   : > { %v970_v17 = vpop.f32.mrb[10].mxu0 }
 0x723   : > { %v974_v18 = vadd.f32 %v968_v15, %v1751_v13  ;;  %v971_v19 = vadd.f32 %v1193_v14, %v970_v17  ;;  %v1263_v20 = vpop.f32.mrb[11].mxu0 }
 0x725   : > { %v978_v21 = vmin.f32 %v974_v18, 0.0  ;;  %v975_v22 = vadd.f32 %v971_v19, %v1758_v1  ;;  %vm976_vm6 = vcmp.gt.f32.partialorder %v974_v18, 0.0 }
 0x727   : > { %v980_v23 = vmul.f32 1.442695, %v978_v21  ;;  %v979_v24 = vmin.f32 %v975_v22, 0.0  ;;  %vm977_vm7 = vcmp.gt.f32.partialorder %v975_v22, 0.0 }
 0x729   : > { %1434 = vpow2.f32 %v980_v23  ;;  %v982_v25 = vmul.f32 1.442695, %v979_v24 }
 0x72b   : > { %1436 = vpow2.f32 %v982_v25 }
 0x733   : > { %v1435_v26 = vpop.eup %1434 }
 0x734   : > { %v1195_v27 = vadd.f32 -1.0, %v1435_v26 }
 0x735   : > { %v1437_v28 = vpop.eup %1436 }
 0x736   : > { %v986_v29 = vsel %vm976_vm6, %v974_v18, %v1195_v27  ;;  %v1196_v30 = vadd.f32 -1.0, %v1437_v28 }
 0x737   : > { %988 = vst.msk [vmem:[#allocation2 + $0x38] sm:$0xff] %vm278_vm0, %v986_v29 }
 0x738   : > { %v987_v13 = vsel %vm977_vm7, %v975_v22, %v1196_v30 }
 0x739   : > { %989 = vst.msk [vmem:[#allocation2 + $0x40] sm:$0xff] %vm278_vm0, %v987_v13 }
 0x740   : > { %v995_v42 = vld [vmem:[#allocation2 + $0x37] ss:$2 sm:$0xff]  ;;  %v993_v1 = vld [vmem:[#allocation2 + $0x36] ss:$2 sm:$0xff] }
 0x741   : > { %1003 = vrot.lane.b32.xlu1 %v995_v42, %s1506_s29  ;;  %999 = vrot.lane.b32.xlu0 %v993_v1, %s1503_s22  ;;  %v997_v31 = vld [vmem:[#allocation2 + $0x38] ss:$2 sm:$0xff]  ;;  %v991_v2 = vld [vmem:[#allocation2 + $0x35] ss:$2 sm:$0xff]  ;;  %s269_s29 = sand.u32 1, %s1492_s25  }
 0x742   : > { %s1150_s15 = sshll.u32 %s269_s29, 3 }
 0x743   : > { %s271_s16 = scalar_lea.vmem [#allocation3], %s1150_s15 }
 0x744   : > { %s1087_s9 = sshll.u32 %s271_s16, 4  ;;  %s1817_s9 = int_to_ptr.vmem [resolvable:$true] %s1087_s9 }
 0x745   : > { %1007 = vrot.lane.b32.xlu0 %v997_v31, %s1505_s23  ;;  %s1201_s23 = sshll.u32 %s1572_s28, 7  ;;  %s1074_s28 = scalar_lea.sflag [#allocation4], %s269_s29 }
 0x746   : > { %s1815_s18 = scalar_lea.hbm %s1865_s7, %s1201_s23  ;;  %s1438_s19 = scalar_lea.vmem %s1817_s9, 128 }
 0x747   : > { %p1439_p11 = scmp.ne.s32.totalorder %s1817_s9, %s1438_s19  ;;  %p1445_p0 = scmp.lt.s32.totalorder %s1817_s9, %s1443_s21 }
 0x748   : > { %p1446_p1 = scmp.lt.s32.totalorder %s1444_s14, %s1438_s19 }
 0x749   : > { %p1440_p12 = pnand %p1439_p11, %p1589_p5 }
 0x74a   : > { %p1447_p2 = por %p1446_p1, %p1445_p0 }
 0x74b   : > { %p1441_p13 = pneg %p1440_p12 }
 0x74d   : > { %p1448_p3 = pnand %p1447_p2, %p1441_p13 }
 0x7b3   : > { %v1000_v33 = vpop.permute.xlu0 %999  ;;  %v1004_v34 = vpop.permute.xlu1 %1003 }
 0x7b4   : > { %v1010_v35 = vsel %vm278_vm0, %v991_v2, %v1000_v33 }
 0x7b5   : > { %v1011_v37 = vsel %vm354_vm3, %v1010_v35, %v1004_v34 }
 0x7b7   : > { %v1008_v36 = vpop.permute.xlu0 %1007 }
 0x7b8   : > { %v1012_v38 = vsel %vm357_vm4, %v1011_v37, %v1008_v36 }
 0x7b9   : > { %v1013_v39 = vpack.c.bf16 %v1012_v38, %v1012_v38 }
 0x7bb   : > { %1267 = vmatmul.mubr.msk.bf16.vlgmr.msra.gmra.mrb[12].mxu1 %vm360_vm5, %v1013_v39 }
 0x88e   : > { %v1066_v41 = vpop.f32.mrb[12].mxu1 }
 0x88f   : > { %v1067_v43 = vadd.f32 %v1197_v40, %v1066_v41  ;;  %v1268_v44 = vpop.f32.mrb[13].mxu1 }
 0x890   : > { %v1069_v45 = vpop.f32.mrb[14].mxu1 }
 0x891   : > { %v1269_v46 = vpop.f32.mrb[15].mxu1  ;;  %1072 = vst.msk [vmem:[%s271_s16] sm:$0xff] %vm354_vm3, %v1067_v43 }
 0x892   : > { %1451 = shalt.err (!%p1448_p3)
}
 0x893   : > { %s1452_s29 = scalar_lea.hbm %s1815_s18, 128  ;;  %s1456_s22 = scalar_lea.hbm %s1865_s7, 256 }
 0x894   : > { %p1453_p4 = scmp.ne.s32.totalorder %s1815_s18, %s1452_s29  ;;  %p1457_p9 = scmp.lt.u32.totalorder %s1815_s18, %s1865_s7 }
 0x895   : > { %p1458_p10 = scmp.lt.u32.totalorder %s1456_s22, %s1452_s29  ;;  %p1460_p12 = scmp.lt.u32.totalorder %s1452_s29, %s1815_s18 }
 0x896   : > { %p1454_p7 = pnand %p1453_p4, %p1589_p5 }
 0x897   : > { %p1459_p11 = por %p1458_p10, %p1457_p9 }
 0x898   : > { %p1455_p8 = pneg %p1454_p7 }
 0x899   : > { %p1461_p13 = por %p1460_p12, %p1459_p11 }
 0x89b   : > { %p1462_p0 = pnand %p1461_p13, %p1455_p8 }
 0x89d   : > { %1465 = shalt.err (!%p1462_p0)
}
 0x89e   : > { %1270 = dma.vmem_to_hbm [thread:$0]  (%p1589_p5), %s1817_s9, 128, %s1815_s18, %s1074_s28  }
 0x89f PF: > { %p1276_p1 = scmp.ge.s32.totalorder %s1500_s27, 2  ;;  %s1099_s13 = sand.u32 1, %s1488_s24  }
 0x8a0   : > { %s1100_s17 = scalar_lea.sflag [#allocation4], %s1099_s13 }
 0x8a1   : > { %p1273_p2 = pnand %p1276_p1, %p1593_p6 }
 0x8a3   : > { %1483 = dma.done.wait (!%p1273_p2), %s1100_s17, 128  }
 0x8a4   : > { %1485 = vsyncadd (!%p1273_p2), %s1100_s17, 4294967168  ;;  %p17_p3 = scmp.ge.s32.totalorder %s1576_s30, 4   ;;  %s1868_s24 = smov %s1492_s25 }
 0x8a5   : > { %s1869_s25 = smov %s1496_s26  ;;  %s1870_s26 = smov %s1587_s10 }
 0x8a6   : > { %s1871_s27 = smov %s1576_s30  ;;  %19 = sbr.rel (!%p17_p3) target bundleno = 3 (0x3), region = 95 }
 0x8ad   :  { %1105 = vsyncpa [#allocation4], 1 }
 0x8ae   :  { %1107 = vsyncpa [#allocation4 + $0x1], 1 }

</bundles_post_ra>
